<compile_context>
chip_gen: v5e
topology: v5e:2x2
jax: 0.10.0
libtpu: 0.0.40
codegen_flags: <defaults>
</compile_context>

<pallas_src>
import functools

import jax
import jax.numpy as jnp
from jax.experimental import pallas as pl
from jax.experimental.pallas import tpu as pltpu


def _round_up(n, m):
    return ((n + m - 1) // m) * m


def policy_net_kernel(x_ref, w1_ref, b1_ref, w2_ref, b2_ref, o_ref):
    # fc1 + ReLU: bf16 operands on the MXU, fp32 accumulation / bias add.
    x = x_ref[...].astype(jnp.bfloat16)                              # (TB, S)
    h = jnp.dot(x, w1_ref[...], preferred_element_type=jnp.float32) + b1_ref[...]
    h = jnp.maximum(h, 0.0).astype(jnp.bfloat16)                     # (TB, H_pad) bf16

    # fc2. Padded action lanes: w2 pad columns are zero and b2 pad lanes are
    # -1e30, so their logits are -1e30 and exp() underflows to 0 — no explicit
    # mask needed in the kernel.
    logits = jnp.dot(h, w2_ref[...],
                     preferred_element_type=jnp.float32) + b2_ref[...]  # (TB, A_pad) f32

    # Numerically stable softmax along dim=1 (action dimension), all in f32.
    m = jnp.max(logits, axis=1, keepdims=True)
    e = jnp.exp(logits - m)
    denom = jnp.sum(e, axis=1, keepdims=True)
    # Exact reciprocal (EUP, essentially free): rows sum to 1 to fp32 precision.
    o_ref[...] = (e * pl.reciprocal(denom, approx=False)).astype(o_ref.dtype)


def prepare_params(w1, b1, w2, b2):
    """One-time padding + bf16 casting of the parameters (call once, reuse).

    w1: (state_dim, hidden), b1: (1, hidden) or (hidden,)
    w2: (hidden, action_dim), b2: (1, action_dim) or (action_dim,)
    """
    S, H = w1.shape
    A = w2.shape[1]
    H_pad = _round_up(H, 128)
    A_pad = _round_up(A, 128)

    b1 = jnp.reshape(b1, (1, H))
    b2 = jnp.reshape(b2, (1, A))

    w1_p = jnp.zeros((S, H_pad), jnp.bfloat16).at[:, :H].set(w1.astype(jnp.bfloat16))
    b1_p = jnp.zeros((1, H_pad), jnp.float32).at[:, :H].set(b1.astype(jnp.float32))
    w2_p = jnp.zeros((H_pad, A_pad), jnp.bfloat16).at[:H, :A].set(w2.astype(jnp.bfloat16))
    # Padded action lanes carry a huge negative bias -> masked out of the softmax.
    b2_p = jnp.full((1, A_pad), -1e30, jnp.float32).at[:, :A].set(b2.astype(jnp.float32))

    return {"w1": w1_p, "b1": b1_p, "w2": w2_p, "b2": b2_p,
            "state_dim": S, "hidden_dim": H, "action_dim": A,
            "H_pad": H_pad, "A_pad": A_pad}


def policy_net_forward(x, params):
    """x: (B, state_dim) f32 -> (B, action_dim) probabilities (f32)."""
    B, S = x.shape
    assert S == params["state_dim"]
    H_pad, A_pad, A = params["H_pad"], params["A_pad"], params["action_dim"]

    # Batch tiling: a single grid step for small/medium batches.
    B_pad8 = _round_up(B, 8)
    TB = min(512, B_pad8)
    B_pad = _round_up(B, TB)
    grid_steps = B_pad // TB

    # Only pad x when the batch is not already tile-aligned (x stays f32;
    # the bf16 cast happens in-kernel right after the load).
    if B_pad != B:
        x_in = jnp.zeros((B_pad, S), x.dtype).at[:B, :].set(x)
    else:
        x_in = x

    # Megacore sharding only pays off once the grid has enough steps.
    semantics = ("parallel",) if grid_steps >= 8 else ("arbitrary",)

    cost = pl.CostEstimate(
        flops=2 * B_pad * S * H_pad + 2 * B_pad * H_pad * A_pad,
        transcendentals=B_pad * A_pad,
        bytes_accessed=(B_pad * S * 4                      # x
                        + S * H_pad * 2 + H_pad * A_pad * 2  # weights (bf16)
                        + (H_pad + A_pad) * 4                # biases
                        + B_pad * A_pad * 4),                # output slab
    )

    out = pl.pallas_call(
        policy_net_kernel,
        out_shape=jax.ShapeDtypeStruct((B_pad, A_pad), jnp.float32),
        grid_spec=pltpu.PrefetchScalarGridSpec(
            num_scalar_prefetch=0,
            grid=(grid_steps,),
            in_specs=[
                # activations: new batch tile per grid step (pipelined)
                pl.BlockSpec((TB, S), lambda i: (i, 0)),
                # weights / biases: constant block index -> VMEM resident
                pl.BlockSpec((S, H_pad), lambda i: (0, 0)),
                pl.BlockSpec((1, H_pad), lambda i: (0, 0)),
                pl.BlockSpec((H_pad, A_pad), lambda i: (0, 0)),
                pl.BlockSpec((1, A_pad), lambda i: (0, 0)),
            ],
            out_specs=pl.BlockSpec((TB, A_pad), lambda i: (i, 0)),
        ),
        compiler_params=pltpu.CompilerParams(dimension_semantics=semantics),
        cost_estimate=cost,
        # VMEM note: resident weights + double-buffered tiles total well under
        # 1 MiB at these shapes; no K-tiling / vmem_limit tuning needed on any
        # of v5e / v6e / v7x unless hidden_dim grows to the tens of thousands.
    )(x_in, params["w1"], params["b1"], params["w2"], params["b2"])

    return out[:B, :A]


def init_params(key, state_dim, hidden_dim, action_dim):
    """Deterministic init mimicking torch.nn.Linear default (U[-1/sqrt(fan_in), +])."""
    k1, k2, k3, k4 = jax.random.split(key, 4)
    bound1 = 1.0 / jnp.sqrt(state_dim)
    bound2 = 1.0 / jnp.sqrt(hidden_dim)
    # stored as (in, out) == transpose of PyTorch's (out, in)
    w1 = jax.random.uniform(k1, (state_dim, hidden_dim), jnp.float32, -bound1, bound1)
    b1 = jax.random.uniform(k2, (1, hidden_dim), jnp.float32, -bound1, bound1)
    w2 = jax.random.uniform(k3, (hidden_dim, action_dim), jnp.float32, -bound2, bound2)
    b2 = jax.random.uniform(k4, (1, action_dim), jnp.float32, -bound2, bound2)
    return w1, b1, w2, b2


if __name__ == "__main__":
    # Small, PPO-like shapes (e.g. CartPole): state_dim=4, hidden=128, actions=2.
    batch, state_dim, hidden_dim, action_dim = 8, 4, 128, 2

    key = jax.random.PRNGKey(0)
    kx, kp = jax.random.split(key)
    x = jax.random.normal(kx, (batch, state_dim), jnp.float32)
    w1, b1, w2, b2 = init_params(kp, state_dim, hidden_dim, action_dim)

    # Parameter padding/casting is done once, outside the per-call path.
    params = prepare_params(w1, b1, w2, b2)

    probs = policy_net_forward(x, params)
    probs = jax.block_until_ready(probs)
    assert probs.shape == (batch, action_dim)

    # Matched-precision reference (bf16 MXU operands, fp32 accumulation).
    xb, w1b, w2b = (t.astype(jnp.bfloat16) for t in (x, w1, w2))
    h_ref = jnp.maximum(jnp.dot(xb, w1b, preferred_element_type=jnp.float32) + b1, 0.0)
    logits_ref = jnp.dot(h_ref.astype(jnp.bfloat16), w2b,
                         preferred_element_type=jnp.float32) + b2
    ref = jax.nn.softmax(logits_ref, axis=1)
    assert jnp.allclose(probs, ref, atol=2e-3, rtol=2e-3)

    # Loose check against the full-fp32 reference (bf16 operand rounding dominates).
    ref_fp32 = jax.nn.softmax(jnp.maximum(x @ w1 + b1, 0.0) @ w2 + b2, axis=1)
    assert jnp.allclose(probs, ref_fp32, atol=3e-2)

    # Exact reciprocal -> rows sum to 1 within fp32 precision.
    assert jnp.allclose(jnp.sum(probs, axis=1), 1.0, atol=1e-5)

    print("KERNEL_OK")
</pallas_src>

<mosaic_0001>
module attributes {stable_mosaic.version = 11 : i64} {
  func.func @policy_net_kernel(%arg0: i32, %arg1: memref<8x4xf32, #tpu.memory_space<vmem>>, %arg2: memref<4x128xbf16, #tpu.memory_space<vmem>>, %arg3: memref<1x128xf32, #tpu.memory_space<vmem>>, %arg4: memref<128x128xbf16, #tpu.memory_space<vmem>>, %arg5: memref<1x128xf32, #tpu.memory_space<vmem>>, %arg6: memref<8x128xf32, #tpu.memory_space<vmem>>) attributes {dimension_semantics = [#tpu.dimension_semantics<arbitrary>], iteration_bounds = array<i64: 1>, scalar_prefetch = 0 : i64, scratch_operands = 0 : i64, tpu.core_type = #tpu.core_type<tc>, window_params = [{transform_indices = @transform_0, window_bounds = array<i64: 8, 4>}, {pipeline_mode = #tpu.pipeline_mode<synchronous>, transform_indices = @transform_1, window_bounds = array<i64: 4, 128>}, {pipeline_mode = #tpu.pipeline_mode<synchronous>, transform_indices = @transform_2, window_bounds = array<i64: 1, 128>}, {pipeline_mode = #tpu.pipeline_mode<synchronous>, transform_indices = @transform_3, window_bounds = array<i64: 128, 128>}, {pipeline_mode = #tpu.pipeline_mode<synchronous>, transform_indices = @transform_4, window_bounds = array<i64: 1, 128>}, {transform_indices = @transform_5, window_bounds = array<i64: 8, 128>}]} {
    %c0 = arith.constant 0 : index
    %c0_0 = arith.constant 0 : index
    %0 = vector.load %arg1[%c0, %c0_0] : memref<8x4xf32, #tpu.memory_space<vmem>>, vector<8x4xf32>
    %1 = arith.truncf %0 : vector<8x4xf32> to vector<8x4xbf16>
    %c0_1 = arith.constant 0 : index
    %c0_2 = arith.constant 0 : index
    %2 = vector.load %arg2[%c0_1, %c0_2] : memref<4x128xbf16, #tpu.memory_space<vmem>>, vector<4x128xbf16>
    %cst = arith.constant dense<0.000000e+00> : vector<8x128xf32>
    %3 = tpu.matmul %1, %2, %cst {dimension_numbers = #tpu.dot_dimension_numbers<[1], [0], [0], [1], [0, 0, 1, 1], [], []>} : vector<8x4xbf16>, vector<4x128xbf16>, vector<8x128xf32> -> vector<8x128xf32>
    %c0_3 = arith.constant 0 : index
    %c0_4 = arith.constant 0 : index
    %4 = vector.load %arg3[%c0_3, %c0_4] : memref<1x128xf32, #tpu.memory_space<vmem>>, vector<1x128xf32>
    %5 = vector.broadcast %4 : vector<1x128xf32> to vector<8x128xf32>
    %6 = arith.addf %3, %5 : vector<8x128xf32>
    %cst_5 = arith.constant 0.000000e+00 : f32
    %7 = vector.broadcast %cst_5 : f32 to vector<8x128xf32>
    %8 = arith.maximumf %6, %7 : vector<8x128xf32>
    %9 = arith.truncf %8 : vector<8x128xf32> to vector<8x128xbf16>
    %c0_6 = arith.constant 0 : index
    %c0_7 = arith.constant 0 : index
    %10 = vector.load %arg4[%c0_6, %c0_7] : memref<128x128xbf16, #tpu.memory_space<vmem>>, vector<128x128xbf16>
    %cst_8 = arith.constant dense<0.000000e+00> : vector<8x128xf32>
    %11 = tpu.matmul %9, %10, %cst_8 {dimension_numbers = #tpu.dot_dimension_numbers<[1], [0], [0], [1], [0, 0, 1, 1], [], []>} : vector<8x128xbf16>, vector<128x128xbf16>, vector<8x128xf32> -> vector<8x128xf32>
    %c0_9 = arith.constant 0 : index
    %c0_10 = arith.constant 0 : index
    %12 = vector.load %arg5[%c0_9, %c0_10] : memref<1x128xf32, #tpu.memory_space<vmem>>, vector<1x128xf32>
    %13 = vector.broadcast %12 : vector<1x128xf32> to vector<8x128xf32>
    %14 = arith.addf %11, %13 : vector<8x128xf32>
    %cst_11 = arith.constant dense<0xFF800000> : vector<8xf32>
    %15 = vector.multi_reduction <maximumf>, %14, %cst_11 [1] : vector<8x128xf32> to vector<8xf32>
    %16 = vector.shape_cast %15 : vector<8xf32> to vector<8x1xf32>
    %17 = vector.broadcast %16 : vector<8x1xf32> to vector<8x128xf32>
    %18 = arith.subf %14, %17 : vector<8x128xf32>
    %19 = math.exp %18 : vector<8x128xf32>
    %cst_12 = arith.constant dense<0.000000e+00> : vector<8xf32>
    %20 = vector.multi_reduction <add>, %19, %cst_12 [1] : vector<8x128xf32> to vector<8xf32>
    %21 = vector.shape_cast %20 : vector<8xf32> to vector<8x1xf32>
    %22 = tpu.reciprocal %21 : vector<8x1xf32> -> vector<8x1xf32>
    %23 = vector.broadcast %22 : vector<8x1xf32> to vector<8x128xf32>
    %24 = arith.mulf %19, %23 : vector<8x128xf32>
    %c0_13 = arith.constant 0 : index
    %c0_14 = arith.constant 0 : index
    %25 = vector.load %arg6[%c0_13, %c0_14] : memref<8x128xf32, #tpu.memory_space<vmem>>, vector<8x128xf32>
    tpu.vector_store %arg6[%c0_13, %c0_14], %24 {strides = array<i32>} : memref<8x128xf32, #tpu.memory_space<vmem>>, vector<8x128xf32>,
    return
  }
  func.func @transform_0(%arg0: i32) -> (i32, i32) {
    %c0_i32 = arith.constant 0 : i32
    %c0_i32_0 = arith.constant 0 : i32
    return %arg0, %c0_i32 : i32, i32
  }
  func.func @transform_1(%arg0: i32) -> (i32, i32) {
    %c0_i32 = arith.constant 0 : i32
    %c0_i32_0 = arith.constant 0 : i32
    %c0_i32_1 = arith.constant 0 : i32
    return %c0_i32, %c0_i32_0 : i32, i32
  }
  func.func @transform_2(%arg0: i32) -> (i32, i32) {
    %c0_i32 = arith.constant 0 : i32
    %c0_i32_0 = arith.constant 0 : i32
    %c0_i32_1 = arith.constant 0 : i32
    return %c0_i32, %c0_i32_0 : i32, i32
  }
  func.func @transform_3(%arg0: i32) -> (i32, i32) {
    %c0_i32 = arith.constant 0 : i32
    %c0_i32_0 = arith.constant 0 : i32
    %c0_i32_1 = arith.constant 0 : i32
    return %c0_i32, %c0_i32_0 : i32, i32
  }
  func.func @transform_4(%arg0: i32) -> (i32, i32) {
    %c0_i32 = arith.constant 0 : i32
    %c0_i32_0 = arith.constant 0 : i32
    %c0_i32_1 = arith.constant 0 : i32
    return %c0_i32, %c0_i32_0 : i32, i32
  }
  func.func @transform_5(%arg0: i32) -> (i32, i32) {
    %c0_i32 = arith.constant 0 : i32
    %c0_i32_0 = arith.constant 0 : i32
    return %arg0, %c0_i32 : i32, i32
  }
}

</mosaic_0001>

<bundles_post_ra>
// kernel: tpu_custom_call.1
= control target key start
LH: loop header
LB: loop body
LE: loop exit
PB: predicated region body
PF: predicated region fallthrough
CT: control target
= control target key end

     0   :  { %10 = vsyncpa [#allocation3], 0  ;;  %s344_s0 = inlined_call_operand.vmem [shape: f32[8,4], index: 0, kind: input, shape index: {}]   ;;  %s345_s1 = inlined_call_operand.vmem [shape: bf16[4,128], index: 1, kind: input, shape index: {}]   ;;  %s346_s2 = inlined_call_operand.vmem [shape: f32[1,128], index: 2, kind: input, shape index: {}]   ;;  %s347_s3 = inlined_call_operand.hbm [shape: bf16[128,128], index: 3, kind: input, shape index: {}]   ;;  %s348_s4 = inlined_call_operand.vmem [shape: f32[1,128], index: 4, kind: input, shape index: {}]   ;;  %s349_s5 = inlined_call_operand.hbm [shape: f32[8,128], index: 5, kind: output, shape index: {}]  }
   0x1   :  { %11 = vsyncpa [#allocation4], 0  ;;  %s22_s20 = sshll.u32 %s347_s3, 4  ;;  %s292_s21 = smov [#allocation2]   ;;  %s23_s20 = int_to_ptr.hbm [resolvable:$true] %s22_s20 }
   0x2   :  { %s24_s22 = sshll.u32 %s292_s21, 4  ;;  %s293_s23 = smov 64   ;;  %s25_s22 = int_to_ptr.vmem [resolvable:$true] %s24_s22 }
   0x3   :  { %s294_s24 = smov 4  }
   0x4   :  { %30 = dma.hbm_to_vmem [thread:$0]  %s23_s20, 1024, %s25_s22, [#allocation3], %s293_s23, %s293_s23, %s294_s24  }
   0x5   :  { %288 = dma.done.wait [#allocation3], 1024  }
   0x6   :  { %289 = vsyncadd [#allocation3], 4294966272  ;;  %vm49_vm0 = vcmask 1041408   ;;  %v40_v0 = vld [vmem:[%s345_s1] sm:$0x3]  ;;  %v229_v2 = vld [vmem:[#allocation2 + $0x38] sm:$0xff] }
   0x7   :  { %v38_v1 = vld [vmem:[%s344_s0] sm:$0xff]  ;;  %v51_v3 = vsel %vm49_vm0, %v40_v0, 0  ;;  %vm45_vm1 = vcmask 31744   ;;  %136 = vmatpush.bf16.msra.mxu1 %v229_v2  ;;  %v228_v5 = vld [vmem:[#allocation2 + $0x30] sm:$0xff]  ;;  %v227_v6 = vld [vmem:[#allocation2 + $0x28] sm:$0xff]  ;;  %s179_s7 = sshll.u32 %s349_s5, 4  ;;  %s180_s7 = int_to_ptr.hbm [resolvable:$true] %s179_s7 }
   0x8   :  { %v39_v4 = vpack.c.bf16 %v38_v1, %v38_v1  ;;  %60 = vmatpush.bf16.msra.mxu0 %v51_v3  ;;  %v226_v7 = vld [vmem:[#allocation2 + $0x20] sm:$0xff]  ;;  %v225_v8 = vld [vmem:[#allocation2 + $0x18] sm:$0xff]  ;;  %v224_v9 = vld [vmem:[#allocation2 + $0x10] sm:$0xff] }
   0x9   :  { %v223_v10 = vld [vmem:[#allocation2 + $0x8] sm:$0xff]  ;;  %v222_v11 = vld [vmem:[#allocation2] sm:$0xff] }
   0xa   :  { %v234_v12 = vld [vmem:[%s346_s2] ss:$0 sm:$0xff]  ;;  %s295_s2 = smov [#allocation5]  }
   0xb   :  { %189 = vmatmul.msk.bf16.vlgmr.msra.gmra.mxu0 %vm45_vm1, %v39_v4  ;;  %137 = vmatpush.bf16.msra.mxu1 %v228_v5  ;;  %v235_v18 = vld [vmem:[%s348_s4] ss:$0 sm:$0xff]  ;;  %s177_s4 = sshll.u32 %s295_s2, 4  ;;  %s178_s4 = int_to_ptr.vmem [resolvable:$true] %s177_s4 }
   0xf   :  { %138 = vmatpush.bf16.msra.mxu1 %v227_v6 }
  0x13   :  { %139 = vmatpush.bf16.msra.mxu1 %v226_v7 }
  0x17   :  { %140 = vmatpush.bf16.msra.mxu1 %v225_v8 }
  0x1b   :  { %141 = vmatpush.bf16.msra.mxu1 %v224_v9 }
  0x1f   :  { %142 = vmatpush.bf16.msra.mxu1 %v223_v10 }
  0x23   :  { %143 = vmatpush.bf16.msra.mxu1 %v222_v11 }
  0x88   :  { %v62_v13 = vpop.f32.mrf.mxu0 }
  0x89   :  { %v63_v14 = vadd.f32 %v234_v12, %v62_v13 }
  0x8b   :  { %v66_v15 = vmax.f32 %v63_v14, 0.0 }
  0x8d   :  { %v67_v16 = vpack.c.bf16 %v66_v15, %v66_v15 }
  0x8f   :  { %144 = vmatmul.bf16.vlgmr.msra.gmra.mxu1 %v67_v16 }
  0x90   :  { %v64_v17 = vpop.f32.mrf.mxu0 }
 0x10c   :  { %v145_v19 = vpop.f32.mrf.mxu1 }
 0x10d   :  { %v146_v20 = vadd.f32 %v235_v18, %v145_v19 }
 0x10f   :  { %149 = vmax.xlane.f32.xlu0 %v146_v20 }
 0x114   :  { %v147_v21 = vpop.f32.mrf.mxu1 }
 0x182   :  { %v150_v22 = vpop.xlane.xlu0 %149 }
 0x183   :  { %v151_v23 = vsub.f32 %v146_v20, %v150_v22 }
 0x185   :  { %v152_v24 = vmul.f32 1.442695, %v151_v23 }
 0x187   :  { %236 = vpow2.f32 %v152_v24 }
 0x18d   :  { %v237_v25 = vpop.eup %236 }
 0x18e   :  { %154 = vadd.xlane.f32.xlu0 %v237_v25 }
 0x201   :  { %v155_v26 = vpop.xlane.xlu0 %154 }
 0x202   :  { %238 = vrcp.f32 %v155_v26  ;;  %v167_v30 = vand.u32 2147483648, %v155_v26  ;;  %v165_v32 = vand.u32 2147483647, %v155_v26  ;;  %vm161_vm3 = vweird.f32 %v155_v26 }
 0x204   :  { %v168_v34 = vor.u32 1.1754944e-38, %v167_v30  ;;  %vm166_vm5 = vcmp.eq.f32.partialorder %v165_v32, 8.507059e+37 }
 0x208   :  { %v239_v27 = vpop.eup %238 }
 0x209   :  { %v157_v28 = vmul.f32 %v239_v27, %v155_v26  ;;  %vm162_vm2 = vweird.f32 %v239_v27 }
 0x20a   :  { %vm163_vm4 = vmor %vm161_vm3, %vm162_vm2 }
 0x20b   :  { %v158_v29 = vsub.f32 1.0, %v157_v28 }
 0x20d   :  { %v159_v31 = vmul.f32 %v239_v27, %v158_v29 }
 0x20f   :  { %v160_v33 = vadd.f32 %v239_v27, %v159_v31 }
 0x211   :  { %v164_v35 = vsel %vm163_vm4, %v239_v27, %v160_v33 }
 0x212   :  { %v169_v36 = vsel %vm166_vm5, %v168_v34, %v164_v35 }
 0x213   :  { %v170_v37 = vmul.f32 %v237_v25, %v169_v36 }
 0x215   :  { %171 = vst [vmem:[#allocation5] sm:$0xff] %v170_v37 }
 0x216   :  { %182 = dma.vmem_to_hbm [thread:$0]  %s178_s4, 128, %s180_s7, [#allocation4]  }
 0x217   :  { %290 = dma.done.wait [#allocation4], 128  }
 0x218   :  { %291 = vsyncadd [#allocation4], 4294967168 }
 0x219   :  { %187 = vsyncpa [#allocation3], 1 }
 0x21a   :  { %188 = vsyncpa [#allocation4], 1 }

</bundles_post_ra>
